<compile_context>
chip_gen: v5e
topology: v5e:2x2
jax: 0.10.0
libtpu: 0.0.40
codegen_flags: <defaults>
</compile_context>

<pallas_src>
import jax
import jax.numpy as jnp
from jax.experimental import pallas as pl
from jax.experimental.pallas import tpu as pltpu

# ---------------------------------------------------------------------------
# Model constants (from WeatherModelV1.__init__)
# ---------------------------------------------------------------------------
CHAR_MAX_VALUE = 127          # encoding.WeatherQuantityEncodingV1.CHAR_MAX_VALUE
VOCAB = CHAR_MAX_VALUE + 1
QM = 16                       # quantity_meaning_dim (== char_embedding_dim)
EMD = 1 + QM                  # entry_meaning_dim = 17 (entry row = [data, emb16])
QRY = 3 + QM                  # query_meaning_dim = 19
QAUG = QRY + 1                # query vector + constant-1 column (carries composed bias)
PMD = 3                       # point meta = [lon, lat, timestamp]
TPM, TAM, TSM = 32, 64, 128   # time-point / area / timespan meaning dims
H1 = 64                       # first post-processor layer width

ROW_GROUP = 128               # original entry rows packed per lane-dense group row
LANES = EMD * ROW_GROUP       # 2176 = 17 * 128  (exactly 17 vregs wide)
PAGE_ROWS = 8 * ROW_GROUP     # 1024 original rows per (8, LANES) page
MLP_W_ROWS = 3 * 64           # packed W2.T / W3.T / W4.T sections


def _cdiv(a, b):
    return -(-a // b)


# ---------------------------------------------------------------------------
# Kernel A: streamed, lane-dense entry-row reduction (the only O(N) work)
# ---------------------------------------------------------------------------
def entry_reduce_kernel(e_ref, out_ref):
    """e_ref: (pg, 8, LANES) page block; out_ref: (8, LANES) per-split partial."""
    @pl.when(pl.program_id(1) == 0)
    def _init():
        out_ref[...] = jnp.zeros_like(out_ref)

    # Pure per-page elementwise vadds on the VPU; the 8-sublane collapse is
    # deferred to the finalize kernel so the hot loop is just vld + vadd.
    # Zero-padded tail rows contribute nothing (1/N is folded into the slab).
    out_ref[...] += jnp.sum(e_ref[...].astype(jnp.float32), axis=0)


# ---------------------------------------------------------------------------
# Kernel B: one-shot finalize (collapse partials + composed layer-1 + ReLU MLP)
# ---------------------------------------------------------------------------
def finalize_kernel(part_ref, slab_ref, bias_ref, w_ref, out_ref):
    dot = lambda a, b: jnp.dot(a, b, preferred_element_type=jnp.float32)

    acc = jnp.sum(part_ref[...], axis=0, keepdims=True)              # (1, LANES)
    # Composed "everything before the first ReLU": (1,2176) @ (2176,64) + bias.
    h = jnp.maximum(dot(acc, slab_ref[...]) + bias_ref[0:1, :], 0.0)  # (1, 64)
    w = w_ref[...]
    h = jnp.maximum(dot(h, w[0:64, :]) + bias_ref[1:2, :], 0.0)       # 64 -> 32 (padded)
    h = jnp.maximum(dot(h, w[64:128, :]) + bias_ref[2:3, :], 0.0)     # 32 -> 16 (padded)
    y = dot(h, w[128:192, :]) + bias_ref[3:4, :]                      # 16 -> 1  (padded)
    out_ref[...] = y[:, 0:1]


# ---------------------------------------------------------------------------
# Parameter construction (deterministic, PyTorch-Linear-style uniform init)
# ---------------------------------------------------------------------------
def init_params(key):
    def linear(key, out_f, in_f):
        k1, k2 = jax.random.split(key)
        bound = 1.0 / jnp.sqrt(in_f)
        W = jax.random.uniform(k1, (out_f, in_f), jnp.float32, -bound, bound)
        b = jax.random.uniform(k2, (out_f,), jnp.float32, -bound, bound)
        return W, b

    keys = jax.random.split(key, 12)
    p = {}
    p["emb"] = jax.random.normal(keys[0], (VOCAB, QM), jnp.float32)
    p["Wq"], p["bq"] = linear(keys[1], QM, QM)                 # quantity_processor 16->16
    p["We"], p["be"] = linear(keys[2], EMD, EMD)               # entry_processor 17->17
    p["Wqi"], p["bqi"] = linear(keys[3], QRY, QRY)             # query processor 19->19
    p["Wtp"], p["btp"] = linear(keys[4], TPM, EMD + QRY + 3)   # 39->32
    p["Wta"], p["bta"] = linear(keys[5], TAM, TPM)             # 32->64
    p["Wts"], p["bts"] = linear(keys[6], TSM, TAM)             # 64->128
    p["W1"], p["b1"] = linear(keys[7], 64, 128)
    p["W2"], p["b2"] = linear(keys[8], 32, 64)
    p["W3"], p["b3"] = linear(keys[9], 16, 32)
    p["W4"], p["b4"] = linear(keys[10], 1, 16)
    return p


# ---------------------------------------------------------------------------
# Trace-time pre-composition of everything before the first ReLU
# ---------------------------------------------------------------------------
def precompose_params(params, N):
    """Fold every Linear + uniform mean (and the first MLP layer) into slabs."""
    Wq, bq = params["Wq"], params["bq"]          # (16,16), (16,)
    We, be = params["We"], params["be"]          # (17,17), (17,)
    Wqi, bqi = params["Wqi"], params["bqi"]      # (19,19), (19,)
    Wtp, btp = params["Wtp"], params["btp"]      # (32,39), (32,)
    Wta, bta = params["Wta"], params["bta"]      # (64,32), (64,)
    Wts, bts = params["Wts"], params["bts"]      # (128,64), (128,)

    Wd, Wez = We[:, :1], We[:, 1:]               # entry_processor cols: [data | quantity]
    Wqm, Wqz = Wqi[:, :3], Wqi[:, 3:]            # query cols: [lonlat,ts | quantity]
    Wte = Wtp[:, :EMD]                           # time-point cols: [entry | query | meta]
    Wtq = Wtp[:, EMD:EMD + QRY]
    Wtm = Wtp[:, EMD + QRY:]

    C = Wta.T @ Wts.T                            # (32,128) area -> timespan
    TeC, TqC, TmC = Wte.T @ C, Wtq.T @ C, Wtm.T @ C

    # Entry rows [data, mean-char-emb(16)] -> timespan meaning.
    M_E = jnp.concatenate([Wd.T, Wq.T @ Wez.T], axis=0) @ TeC            # (17,128)
    # Every Linear bias pushed through the chain (rides on the query's 1-col).
    chain_bias = ((bq @ Wez.T + be) @ TeC
                  + (bq @ Wqz.T + bqi) @ TqC
                  + btp @ C + bta @ Wts.T + bts)                         # (128,)
    # Query vector [lonlat(2), ts(1), mean-char-emb(16), 1] -> timespan meaning.
    M_Q = jnp.concatenate([Wqm.T @ TqC, Wq.T @ Wqz.T @ TqC, chain_bias[None, :]],
                          axis=0)                                        # (20,128)
    M_P = TmC                                                            # (3,128)

    # Fold in the first post-processor Linear (128->64) as well.
    W1T = params["W1"].T                                                 # (128,64)
    E1 = (M_E / N) @ W1T                                                 # (17,64)
    # Tile 128x along rows so the lane-dense 2176-wide stream sum can be folded
    # with a single MXU dot (row j of the slab corresponds to entry column j%17).
    ent_slab = jnp.tile(E1, (ROW_GROUP, 1)).astype(jnp.float32)          # (2176,64)
    MQ1 = (M_Q @ W1T).astype(jnp.float32)                                # (20,64)
    MP1 = (M_P @ W1T).astype(jnp.float32)                                # (3,64)

    # Remaining MLP layers packed into a single zero-padded lane-64 slab.
    mlp_w = jnp.zeros((MLP_W_ROWS, H1), jnp.float32)
    mlp_w = mlp_w.at[0:64, 0:32].set(params["W2"].T)
    mlp_w = mlp_w.at[64:96, 0:16].set(params["W3"].T)
    mlp_w = mlp_w.at[128:144, 0:1].set(params["W4"].T)
    return ent_slab, MQ1, MP1, mlp_w


# ---------------------------------------------------------------------------
# Wrapper: glue (embedding gather) + slab packing + two pallas_calls
# ---------------------------------------------------------------------------
def weather_model_forward(params, raw, A, P, E, *, block_rows=32768,
                          entry_dtype=jnp.bfloat16, num_splits=2):
    N, AP = A * P * E, A * P
    emb = params["emb"]

    # TODO(synk): the char-embedding gather + per-entry char mean is a
    # data-dependent integer gather; kept in plain JAX (no clean Pallas path).
    # TODO(synk): review opt #7 (replace the stream with a VOCAB-bin char
    # histogram contracted with a precomposed slab) not taken here.
    e_emb = emb[raw["entry_chars"]].mean(axis=-2).reshape(N, QM)           # (N,16)
    e_data = raw["entry_data"].reshape(N, 1)
    e_rows = jnp.concatenate([e_data, e_emb], axis=1).astype(entry_dtype)  # (N,17)

    q_emb = emb[raw["q_chars"]].mean(axis=0)                               # (16,)
    q_aug = jnp.concatenate(
        [raw["q_lonlat"], raw["q_ts"], q_emb, jnp.ones((1,), jnp.float32)]
    ).reshape(1, QAUG)                                                     # (1,20)
    p_meta = jnp.concatenate([raw["point_lonlat"], raw["point_ts"]],
                             axis=-1).reshape(AP, PMD)
    p_mean = jnp.mean(p_meta, axis=0, keepdims=True)                       # (1,3)

    ent_slab, MQ1, MP1, mlp_w = precompose_params(params, N)
    # Query / point-meta terms folded into the first-layer bias (tiny JAX math).
    b1_eff = q_aug @ MQ1 + p_mean @ MP1 + params["b1"][None, :]            # (1,64)
    bias = jnp.zeros((8, H1), jnp.float32)
    bias = bias.at[0, :].set(b1_eff[0])
    bias = bias.at[1, 0:32].set(params["b2"])
    bias = bias.at[2, 0:16].set(params["b3"])
    bias = bias.at[3, 0:1].set(params["b4"])

    # ---- grid sizing: lane-dense pages of 1024 original rows ((8, 2176)) ----
    itemsize = jnp.dtype(entry_dtype).itemsize
    pages_needed = _cdiv(N, PAGE_ROWS)
    pg = max(1, block_rows // PAGE_ROWS)                       # pages per grid step
    # Cap double-buffered block bytes (~<=16 MiB) so vmem_limit stays safe.
    pg = min(pg, max(1, (8 * 1024 * 1024) // (8 * LANES * itemsize)))
    pg = min(pg, max(1, _cdiv(pages_needed, num_splits)))
    bps = _cdiv(pages_needed, num_splits * pg)                 # blocks per split
    total_pages = num_splits * bps * pg
    n_pad = total_pages * PAGE_ROWS
    if n_pad != N:
        e_rows = jnp.pad(e_rows, ((0, n_pad - N), (0, 0)))     # zero rows: no-op in sum
    e_pages = e_rows.reshape(total_pages, 8, LANES)            # free: contiguous data

    def e_index(s, i):
        return (s * bps + i, 0, 0)

    partials = pl.pallas_call(
        entry_reduce_kernel,
        out_shape=jax.ShapeDtypeStruct((num_splits * 8, LANES), jnp.float32),
        grid_spec=pltpu.PrefetchScalarGridSpec(
            num_scalar_prefetch=0,
            grid=(num_splits, bps),
            in_specs=[pl.BlockSpec((pg, 8, LANES), e_index)],
            out_specs=pl.BlockSpec((8, LANES), lambda s, i: (s, 0)),
        ),
        compiler_params=pltpu.CompilerParams(
            # Each split owns its own output rows -> the leading axis is
            # race-free "parallel" (v7x shards it across its 2 TensorCores);
            # the per-split block axis is the reduction -> "arbitrary".
            dimension_semantics=("parallel", "arbitrary"),
            vmem_limit_bytes=32 * 1024 * 1024,
        ),
    )(e_pages)

    out = pl.pallas_call(
        finalize_kernel,
        out_shape=jax.ShapeDtypeStruct((1, 1), jnp.float32),
        grid_spec=pltpu.PrefetchScalarGridSpec(
            num_scalar_prefetch=0,
            grid=(1,),
            in_specs=[pl.BlockSpec((num_splits * 8, LANES), lambda i: (0, 0)),
                      pl.BlockSpec((LANES, H1), lambda i: (0, 0)),
                      pl.BlockSpec((8, H1), lambda i: (0, 0)),
                      pl.BlockSpec((MLP_W_ROWS, H1), lambda i: (0, 0))],
            out_specs=pl.BlockSpec((1, 1), lambda i: (0, 0)),
        ),
        compiler_params=pltpu.CompilerParams(
            dimension_semantics=("arbitrary",),
            vmem_limit_bytes=32 * 1024 * 1024,
        ),
    )(partials, ent_slab, bias, mlp_w)
    return out[0]   # shape (1,), matching torch post_processor output


# ---------------------------------------------------------------------------
# Pure-JAX reference mirroring the nested torch forward (vectorized, faithful)
# ---------------------------------------------------------------------------
def ref_forward(params, raw, A, P, E):
    emb = params["emb"]
    cmean = emb[raw["entry_chars"]].mean(axis=-2)                        # (A,P,E,16)
    qmean = cmean @ params["Wq"].T + params["bq"]                        # quantity meanings
    entries = (jnp.concatenate([raw["entry_data"], qmean], axis=-1)
               @ params["We"].T + params["be"])                          # (A,P,E,17)
    q_quant = emb[raw["q_chars"]].mean(axis=0) @ params["Wq"].T + params["bq"]
    query_meaning = (jnp.concatenate([raw["q_lonlat"], raw["q_ts"], q_quant])
                     @ params["Wqi"].T + params["bqi"])                  # (19,)
    meta = jnp.concatenate([raw["point_lonlat"], raw["point_ts"]], axis=-1)  # (A,P,3)
    x = jnp.concatenate([entries.mean(axis=2),
                         jnp.broadcast_to(query_meaning, (A, P, QRY)),
                         meta], axis=-1)                                 # (A,P,39)
    tp = x @ params["Wtp"].T + params["btp"]                             # (A,P,32)
    area = (tp @ params["Wta"].T + params["bta"]).mean(axis=1)           # (A,64)
    ts = (area @ params["Wts"].T + params["bts"]).mean(axis=0)           # (128,)
    h = jnp.maximum(ts @ params["W1"].T + params["b1"], 0.0)
    h = jnp.maximum(h @ params["W2"].T + params["b2"], 0.0)
    h = jnp.maximum(h @ params["W3"].T + params["b3"], 0.0)
    return h @ params["W4"].T + params["b4"]


# ---------------------------------------------------------------------------
if __name__ == "__main__":
    key = jax.random.PRNGKey(0)
    pkey, dkey = jax.random.split(key)
    params = init_params(pkey)

    def make_raw(key, A, P, E, L=8, LQ=6):
        ks = jax.random.split(key, 7)
        return {
            "entry_chars": jax.random.randint(ks[0], (A, P, E, L), 0, VOCAB),
            "entry_data":  jax.random.normal(ks[1], (A, P, E, 1), jnp.float32),
            "point_lonlat": jax.random.normal(ks[2], (A, P, 2), jnp.float32),
            "point_ts":     jax.random.normal(ks[3], (A, P, 1), jnp.float32),
            "q_chars":  jax.random.randint(ks[4], (LQ,), 0, VOCAB),
            "q_lonlat": jax.random.normal(ks[5], (2,), jnp.float32),
            "q_ts":     jax.random.normal(ks[6], (1,), jnp.float32),
        }

    k1, k2 = jax.random.split(dkey)

    # Config 1: tiny shapes consistent with the module (2 areas, 3 points, 4 entries).
    A, P, E = 2, 3, 4
    raw1 = make_raw(k1, A, P, E)
    ref1 = jax.block_until_ready(ref_forward(params, raw1, A, P, E))
    out_f32 = jax.block_until_ready(
        weather_model_forward(params, raw1, A, P, E, entry_dtype=jnp.float32))
    assert out_f32.shape == (1,), out_f32.shape
    assert jnp.allclose(out_f32, ref1, rtol=1e-4, atol=1e-4), (out_f32, ref1)
    out_bf16 = jax.block_until_ready(
        weather_model_forward(params, raw1, A, P, E))   # default bf16 streaming
    assert jnp.allclose(out_bf16, ref1, rtol=3e-2, atol=3e-2), (out_bf16, ref1)

    # Config 2: enough entry rows to exercise multiple pipelined blocks per split
    # (N = 3200 -> 4 pages -> grid (num_splits=2, blocks_per_split=2)).
    A2, P2, E2 = 2, 4, 400
    raw2 = make_raw(k2, A2, P2, E2)
    ref2 = jax.block_until_ready(ref_forward(params, raw2, A2, P2, E2))
    out2 = jax.block_until_ready(
        weather_model_forward(params, raw2, A2, P2, E2, block_rows=1024))
    assert out2.shape == (1,), out2.shape
    assert jnp.allclose(out2, ref2, rtol=3e-2, atol=3e-2), (out2, ref2)

    print("KERNEL_OK")
</pallas_src>

<mosaic_0001>
module attributes {stable_mosaic.version = 11 : i64} {
  func.func @entry_reduce_kernel(%arg0: i32, %arg1: i32, %arg2: memref<1x8x2176xf32, #tpu.memory_space<vmem>>, %arg3: memref<8x2176xf32, #tpu.memory_space<vmem>>) attributes {dimension_semantics = [#tpu.dimension_semantics<parallel>, #tpu.dimension_semantics<arbitrary>], iteration_bounds = array<i64: 2, 1>, scalar_prefetch = 0 : i64, scratch_operands = 0 : i64, tpu.core_type = #tpu.core_type<tc>, window_params = [{transform_indices = @transform_0, window_bounds = array<i64: 1, 8, 2176>}, {transform_indices = @transform_1, window_bounds = array<i64: 8, 2176>}]} {
    %c0_i32 = arith.constant 0 : i32
    %0 = arith.cmpi eq, %arg1, %c0_i32 : i32
    %1 = arith.extui %0 : i1 to i32
    %c0_i32_0 = arith.constant 0 : i32
    %2 = arith.cmpi ne, %1, %c0_i32_0 : i32
    scf.if %2 {
      %cst_7 = arith.constant 0.000000e+00 : f32
      %8 = vector.broadcast %cst_7 : f32 to vector<8x2176xf32>
      %c0_8 = arith.constant 0 : index
      %c0_9 = arith.constant 0 : index
      %9 = vector.load %arg3[%c0_8, %c0_9] : memref<8x2176xf32, #tpu.memory_space<vmem>>, vector<8x2176xf32>
      tpu.vector_store %arg3[%c0_8, %c0_9], %8 {strides = array<i32>} : memref<8x2176xf32, #tpu.memory_space<vmem>>, vector<8x2176xf32>,
    } else {
    }
    %c0 = arith.constant 0 : index
    %c0_1 = arith.constant 0 : index
    %3 = vector.load %arg3[%c0, %c0_1] : memref<8x2176xf32, #tpu.memory_space<vmem>>, vector<8x2176xf32>
    %c0_2 = arith.constant 0 : index
    %c0_3 = arith.constant 0 : index
    %c0_4 = arith.constant 0 : index
    %4 = vector.load %arg2[%c0_2, %c0_3, %c0_4] : memref<1x8x2176xf32, #tpu.memory_space<vmem>>, vector<1x8x2176xf32>
    %cst = arith.constant dense<0.000000e+00> : vector<8x2176xf32>
    %5 = vector.multi_reduction <add>, %4, %cst [0] : vector<1x8x2176xf32> to vector<8x2176xf32>
    %6 = arith.addf %3, %5 : vector<8x2176xf32>
    %c0_5 = arith.constant 0 : index
    %c0_6 = arith.constant 0 : index
    %7 = vector.load %arg3[%c0_5, %c0_6] : memref<8x2176xf32, #tpu.memory_space<vmem>>, vector<8x2176xf32>
    tpu.vector_store %arg3[%c0_5, %c0_6], %6 {strides = array<i32>} : memref<8x2176xf32, #tpu.memory_space<vmem>>, vector<8x2176xf32>,
    return
  }
  func.func @transform_0(%arg0: i32, %arg1: i32) -> (i32, i32, i32) {
    %c1_i32 = arith.constant 1 : i32
    %0 = arith.muli %arg0, %c1_i32 : i32
    %1 = arith.addi %0, %arg1 : i32
    %c0_i32 = arith.constant 0 : i32
    %c0_i32_0 = arith.constant 0 : i32
    %c0_i32_1 = arith.constant 0 : i32
    return %1, %c0_i32, %c0_i32_0 : i32, i32, i32
  }
  func.func @transform_1(%arg0: i32, %arg1: i32) -> (i32, i32) {
    %c0_i32 = arith.constant 0 : i32
    %c0_i32_0 = arith.constant 0 : i32
    return %arg0, %c0_i32 : i32, i32
  }
}

</mosaic_0001>

<bundles_post_ra>
// kernel: tpu_custom_call.1
= control target key start
LH: loop header
LB: loop body
LE: loop exit
PB: predicated region body
PF: predicated region fallthrough
CT: control target
= control target key end

     0   :  { %6 = vsyncpa [#allocation3], 0  ;;  %s712_s0 = inlined_call_operand.hbm [shape: f32[2,8,2176], index: 0, kind: input, shape index: {}]   ;;  %s713_s1 = inlined_call_operand.hbm [shape: f32[16,2176], index: 1, kind: output, shape index: {}]  }
   0x1   :  { %8 = vsyncpa [#allocation3 + $0x1], 0 }
   0x2   :  { %9 = vsyncpa [#allocation4], 0 }
   0x3   :  { %11 = vsyncpa [#allocation4 + $0x1], 0  ;;  %s553_s6 = smov 0   ;;  %s555_s7 = smov 0  }
   0x4   :  { %s557_s8 = smov 0   ;;  %s559_s9 = smov 0  }
   0x5   :  { %s561_s10 = smov 0   ;;  %s563_s11 = smov 0  }
   0x6 LB: > { %s353_s12 = sadd.s32 4294967295, %s541_s11   ;;  %s354_s13 = sadd.s32 4294967294, %s541_s11   ;;  %s541_s11 = sphi %s563_s11, %s17_s11   ;;  %s537_s10 = sphi %s561_s10, %s722_s10   ;;  %s533_s9 = sphi %s559_s9, %s721_s9   ;;  %s529_s8 = sphi %s557_s8, %s720_s8   ;;  %s525_s7 = sphi %s555_s7, %s719_s7   ;;  %s521_s6 = sphi %s553_s6, %s718_s6  }
   0x7   : > { %s29_s14 = sadd.s32 1, %s537_s10  ;;  %s38_s15 = sadd.s32 1, %s529_s8 }
   0x8   : > { %p31_p0 = scmp.ge.s32.totalorder %s29_s14, 2  ;;  %p45_p1 = scmp.ne.s32.totalorder %s529_s8, %s525_s7 }
   0x9   : > { %p46_p2 = scmp.eq.s32.totalorder %s541_s11, 0  ;;  %p51_p3 = scmp.ne.s32.totalorder %s525_s7, %s521_s6 }
   0xa   : > { %s724_s14 = smov (%p31_p0, %s29_s14), 0  ;;  %p52_p5 = scmp.eq.s32.totalorder %s353_s12, 0 }
   0xb   : > { %p594_p4 = por %p46_p2, %p45_p1  ;;  %s35_s17 = ssub.s32 %s537_s10, %s724_s14 }
   0xc   : > { %p75_p6 = scmp.eq.s32.totalorder %s353_s12, 1  ;;  %p36_p7 = scmp.eq.s32.totalorder %s35_s17, 0 }
   0xd   : > { %p600_p8 = por %p52_p5, %p51_p3  ;;  %p81_p10 = scmp.eq.s32.totalorder %s354_s13, 1 }
   0xe   : > { %p604_p9 = por %p75_p6, %p45_p1  ;;  %p356_p12 = scmp.ge.s32.totalorder %s541_s11, 2 }
   0xf   : > { %s609_s20 = scalar_select %p36_p7, %s529_s8, %s38_s15  }
  0x10   : > { %p611_p11 = por %p81_p10, %p51_p3  ;;  %p378_p13 = scmp.lt.s32.totalorder %s541_s11, 2 }
  0x11   : > { %s101_s22 = sand.u32 1, %s529_s8   ;;  %s363_s24 = smul.u32 136, %s537_s10 }
  0x12   : > { %s362_s23 = smul.u32 136, %s101_s22  ;;  %p371_p0 = pnand %p378_p13, %p594_p4 }
  0x13   : > { %p358_p2 = scmp.ge.s32.totalorder %s541_s11, 1  ;;  %s111_s27 = scalar_lea.hbm %s712_s0, %s363_s24 }
  0x14   : > { %s105_s28 = scalar_lea.vmem [#allocation2], %s362_s23  ;;  %s113_s30 = sshll.u32 %s111_s27, 4  ;;  %s114_s30 = int_to_ptr.hbm [resolvable:$true] %s113_s30 }
  0x15   : > { %s115_s29 = sshll.u32 %s105_s28, 4  ;;  %s102_s2 = scalar_lea.sflag [#allocation3], %s101_s22  ;;  %s116_s29 = int_to_ptr.vmem [resolvable:$true] %s115_s29 }
  0x16   : > { %373 = dma.hbm_to_vmem [thread:$0]  (!%p371_p0), %s114_s30, 2176, %s116_s29, %s102_s2  }
  0x17   : > { %p120_p1 = scmp.lt.s32.totalorder %s541_s11, 3 }
  0x19   : > { %p121_p3 = pnand %p358_p2, %p120_p1 }
  0x1a   : > { %s627_s3 = sand.u32 (!%p121_p3), 1, %s525_s7  }
  0x1b   : > { %124 = sbr.rel (%p121_p3) target bundleno = 53 (0x35), region = 24  ;;  %s127_s5 = scalar_lea.sflag (!%p121_p3), [#allocation3], %s627_s3 }
  0x1c   : > { %s364_s4 = smul.u32 (!%p121_p3), 136, %s627_s3 }
  0x1e   : > { %s631_s12 = scalar_lea.vmem (!%p121_p3), [#allocation2], %s364_s4 }
  0x20   : > { %512 = dma.done.wait (%p600_p8), %s127_s5, 2176  }
  0x21   : > { %514 = vsyncadd (%p600_p8), %s127_s5, 4294965120  ;;  %v189_v0 = vld [vmem:[%s631_s12] sm:$0xff]  ;;  %v190_v1 = vld [vmem:[%s631_s12 + $0x8] sm:$0xff]  ;;  %s644_s13 = scalar_lea.vmem [#allocation5], %s364_s4  ;;  %s365_s15 = smul.u32 136, %s533_s9 }
  0x22   : > { %v191_v2 = vld [vmem:[%s631_s12 + $0x10] sm:$0xff]  ;;  %v192_v3 = vld [vmem:[%s631_s12 + $0x18] sm:$0xff]  ;;  %v193_v4 = vld [vmem:[%s631_s12 + $0x20] sm:$0xff]  ;;  %240 = vst [vmem:[%s644_s13] sm:$0xff] %v189_v0  ;;  %s271_s9 = sshll.u32 %s644_s13, 4  ;;  %s258_s23 = scalar_lea.sflag [#allocation4], %s627_s3  ;;  %s272_s9 = int_to_ptr.vmem [resolvable:$true] %s271_s9 }
  0x23   : > { %v194_v5 = vld [vmem:[%s631_s12 + $0x28] sm:$0xff]  ;;  %v195_v6 = vld [vmem:[%s631_s12 + $0x30] sm:$0xff]  ;;  %v196_v7 = vld [vmem:[%s631_s12 + $0x38] sm:$0xff]  ;;  %241 = vst [vmem:[%s644_s13 + $0x8] sm:$0xff] %v190_v1  ;;  %s269_s18 = scalar_lea.hbm %s713_s1, %s365_s15  ;;  %s479_s28 = scalar_lea.hbm %s713_s1, 272 }
  0x24   : > { %v197_v8 = vld [vmem:[%s631_s12 + $0x40] sm:$0xff]  ;;  %242 = vst [vmem:[%s644_s13 + $0x10] sm:$0xff] %v191_v2  ;;  %v198_v9 = vld [vmem:[%s631_s12 + $0x48] sm:$0xff]  ;;  %v199_v10 = vld [vmem:[%s631_s12 + $0x50] sm:$0xff]  ;;  %s273_s22 = sshll.u32 %s269_s18, 4  ;;  %s274_s22 = int_to_ptr.hbm [resolvable:$true] %s273_s22 }
  0x25   : > { %243 = vst [vmem:[%s644_s13 + $0x18] sm:$0xff] %v192_v3  ;;  %v200_v11 = vld [vmem:[%s631_s12 + $0x58] sm:$0xff]  ;;  %v201_v12 = vld [vmem:[%s631_s12 + $0x60] sm:$0xff]  ;;  %v202_v13 = vld [vmem:[%s631_s12 + $0x68] sm:$0xff]  ;;  %s473_s24 = sshra.s32 %s274_s22, 4  ;;  %s474_s24 = int_to_ptr.hbm [resolvable:$true] %s473_s24 }
  0x26   : > { %244 = vst [vmem:[%s644_s13 + $0x20] sm:$0xff] %v193_v4  ;;  %v203_v14 = vld [vmem:[%s631_s12 + $0x70] sm:$0xff]  ;;  %v204_v15 = vld [vmem:[%s631_s12 + $0x78] sm:$0xff]  ;;  %v205_v16 = vld [vmem:[%s631_s12 + $0x80] sm:$0xff]  ;;  %s475_s25 = scalar_lea.hbm %s474_s24, 136  ;;  %p480_p7 = scmp.lt.s32.totalorder %s474_s24, %s713_s1 }
  0x27   : > { %245 = vst [vmem:[%s644_s13 + $0x28] sm:$0xff] %v194_v5  ;;  %p476_p4 = scmp.ne.s32.totalorder %s474_s24, %s475_s25  ;;  %p481_p8 = scmp.lt.s32.totalorder %s479_s28, %s475_s25 }
  0x28   : > { %246 = vst [vmem:[%s644_s13 + $0x30] sm:$0xff] %v195_v6 }
  0x29   : > { %247 = vst [vmem:[%s644_s13 + $0x38] sm:$0xff] %v196_v7  ;;  %p477_p5 = pnand %p476_p4, %p604_p9  ;;  %p482_p10 = por %p481_p8, %p480_p7 }
  0x2a   : > { %248 = vst [vmem:[%s644_s13 + $0x40] sm:$0xff] %v197_v8 }
  0x2b   : > { %249 = vst [vmem:[%s644_s13 + $0x48] sm:$0xff] %v198_v9  ;;  %p478_p6 = pneg %p477_p5 }
  0x2c   : > { %250 = vst [vmem:[%s644_s13 + $0x50] sm:$0xff] %v199_v10 }
  0x2d   : > { %251 = vst [vmem:[%s644_s13 + $0x58] sm:$0xff] %v200_v11  ;;  %p483_p13 = pnand %p482_p10, %p478_p6 }
  0x2e   : > { %252 = vst [vmem:[%s644_s13 + $0x60] sm:$0xff] %v201_v12 }
  0x2f   : > { %253 = vst [vmem:[%s644_s13 + $0x68] sm:$0xff] %v202_v13 }
  0x30   : > { %254 = vst [vmem:[%s644_s13 + $0x70] sm:$0xff] %v203_v14 }
  0x31   : > { %255 = vst [vmem:[%s644_s13 + $0x78] sm:$0xff] %v204_v15 }
  0x32   : > { %256 = vst [vmem:[%s644_s13 + $0x80] sm:$0xff] %v205_v16 }
  0x33   : > { %486 = shalt.err (!%p483_p13)
}
  0x34   : > { %368 = dma.vmem_to_hbm [thread:$0]  (%p604_p9), %s272_s9, 2176, %s274_s22, %s258_s23  }
  0x35 PF: > { %s285_s2 = sand.u32 1, %s521_s6   ;;  %p375_p0 = pnand %p356_p12, %p611_p11 }
  0x36   : > { %s286_s3 = scalar_lea.sflag [#allocation4], %s285_s2 }
  0x37   : > { %p376_p2 = pneg %p375_p0 }
  0x39   : > { %516 = dma.done.wait (%p376_p2), %s286_s3, 2176  }
  0x3a   : > { %518 = vsyncadd (%p376_p2), %s286_s3, 4294965120  ;;  %s17_s11 = sadd.s32 1, %s541_s11   ;;  %s718_s6 = smov %s525_s7 }
  0x3b   : > { %p14_p1 = scmp.ge.s32.totalorder %s17_s11, 4   ;;  %s719_s7 = smov %s529_s8 }
  0x3c   : > { %s720_s8 = smov %s609_s20  ;;  %s721_s9 = smov %s537_s10 }
  0x3d   : > { %s722_s10 = smov %s724_s14  ;;  %16 = sbr.rel (!%p14_p1) target bundleno = 6 (0x6), region = 73 }
  0x42   :  { %292 = vsyncpa [#allocation3], 1 }
  0x43   :  { %294 = vsyncpa [#allocation3 + $0x1], 1 }
  0x44   :  { %295 = vsyncpa [#allocation4], 1 }
  0x45   :  { %297 = vsyncpa [#allocation4 + $0x1], 1 }

</bundles_post_ra>
